<compile_context>
chip_gen: v7x
topology: tpu7x:2x2x1
jax: 0.10.0
libtpu: 0.0.40
codegen_flags: <defaults>
</compile_context>

<pallas_src>
import functools

import jax
import jax.numpy as jnp
from jax.experimental import pallas as pl
from jax.experimental.pallas import tpu as pltpu


def _round_up(v, m):
    return (v + m - 1) // m * m


def _pick_node_tile(n_pad):
    # Lane-dense node tile; n_pad is always a multiple of 128.
    for tn in (512, 256, 128):
        if n_pad % tn == 0:
            return tn
    return n_pad


def _pad_gate_weight(w, out_f, o_pad, cols, cols_pad):
    """(4*out_f, cols) -> (4*o_pad, cols_pad), zero-padded per gate block."""
    w4 = w.reshape(4, out_f, cols)
    w4 = jnp.pad(w4, ((0, 0), (0, o_pad - out_f), (0, cols_pad - cols)))
    return w4.reshape(4 * o_pad, cols_pad)


def _prepare_static(adjacency, weight, bias, in_f, out_f, mm_dtype):
    """Pad/split/cast the per-model constants once (adjacency, W, b)."""
    N = adjacency.shape[0]
    n_pad = _round_up(N, 128)        # lane-dense node axis
    in_f_pad = _round_up(in_f, 8)    # sublane-aligned per-batch feature slabs
    o_pad = _round_up(out_f, 8)      # sublane-aligned gate slices
    f32 = jnp.float32

    adj = jnp.pad(adjacency.astype(f32),
                  ((0, n_pad - N), (0, n_pad - N))).astype(mm_dtype)
    w = weight.astype(f32)
    # Split W into x / h column blocks: replaces a per-call [x ; h] concat.
    w_x = _pad_gate_weight(w[:, :in_f], out_f, o_pad, in_f, in_f_pad).astype(mm_dtype)
    w_h = _pad_gate_weight(w[:, in_f:], out_f, o_pad, out_f, o_pad).astype(mm_dtype)
    b2d = jnp.pad(bias.astype(f32).reshape(4, out_f),
                  ((0, 0), (0, o_pad - out_f))).reshape(4 * o_pad, 1)
    return adj, w_x, w_h, b2d, n_pad, in_f_pad, o_pad


def _pad_fold(x, f_pad, n_pad):
    """(B, F, N) -> (B*f_pad, n_pad), batch folded into the row (MXU M) axis."""
    B, F, N = x.shape
    xp = jnp.pad(x, ((0, 0), (0, f_pad - F), (0, n_pad - N)))
    return xp.reshape(B * f_pad, n_pad)


# ---------------------------------------------------------------------------
# Single-step cell kernel (node-column tiled grid)
# ---------------------------------------------------------------------------
def _gcnlstm_cell_kernel(x_ref, h_ref, c_ref, adj_ref, wx_ref, wh_ref, b_ref,
                         hn_ref, cn_ref, *, batch, in_f_pad, o_pad, mm_dtype):
    four_o = 4 * o_pad
    tn = adj_ref.shape[1]

    adj = adj_ref[...]                                              # (n_pad, TN)
    # Batch folded into the MXU M dimension: one aggregation matmul per input.
    agg_x = jnp.dot(x_ref[...], adj, preferred_element_type=jnp.float32)  # (B*in_f_pad, TN)
    agg_h = jnp.dot(h_ref[...], adj, preferred_element_type=jnp.float32)  # (B*o_pad,  TN)

    wx = wx_ref[...]
    wh = wh_ref[...]
    bias = jnp.broadcast_to(b_ref[...], (four_o, tn))   # hoisted out of the batch loop

    for b in range(batch):                               # static, small B
        ax = agg_x[b * in_f_pad:(b + 1) * in_f_pad].astype(mm_dtype)
        ah = agg_h[b * o_pad:(b + 1) * o_pad].astype(mm_dtype)
        gates = (jnp.dot(wx, ax, preferred_element_type=jnp.float32)
                 + jnp.dot(wh, ah, preferred_element_type=jnp.float32)
                 + bias)                                             # (4*o_pad, TN) f32

        i = jax.nn.sigmoid(gates[0 * o_pad:1 * o_pad])
        f = jax.nn.sigmoid(gates[1 * o_pad:2 * o_pad])
        o = jax.nn.sigmoid(gates[2 * o_pad:3 * o_pad])
        g = jnp.tanh(gates[3 * o_pad:4 * o_pad])

        c_cur = c_ref[pl.ds(b * o_pad, o_pad), :]
        c_next = f * c_cur + i * g
        hn_ref[pl.ds(b * o_pad, o_pad), :] = o * jnp.tanh(c_next)
        cn_ref[pl.ds(b * o_pad, o_pad), :] = c_next


def gcnlstm_cell(node_features, adjacency, h_cur, c_cur, weight, bias,
                 matmul_dtype=jnp.float32):
    """Single-step GCNLSTMCell forward (matches the PyTorch module).

    node_features : (B, in_f, N)     adjacency : (N, N)
    h_cur, c_cur  : (B, out_f, N)    weight    : (4*out_f, in_f+out_f)
    bias          : (4*out_f,)
    returns (h_next, c_next), each (B, out_f, N) float32
    """
    B, in_f, N = node_features.shape
    out_f = h_cur.shape[1]
    f32 = jnp.float32
    mm = matmul_dtype

    adj, w_x, w_h, b2d, n_pad, in_f_pad, o_pad = _prepare_static(
        adjacency, weight, bias, in_f, out_f, mm)
    four_o = 4 * o_pad
    tn = _pick_node_tile(n_pad)
    num_tiles = n_pad // tn

    x_flat = _pad_fold(node_features.astype(f32), in_f_pad, n_pad).astype(mm)
    h_flat = _pad_fold(h_cur.astype(f32), o_pad, n_pad).astype(mm)
    c_flat = _pad_fold(c_cur.astype(f32), o_pad, n_pad)            # f32 state

    kernel = functools.partial(_gcnlstm_cell_kernel, batch=B,
                               in_f_pad=in_f_pad, o_pad=o_pad, mm_dtype=mm)

    f_tot = in_f_pad + o_pad
    itm = jnp.dtype(mm).itemsize
    cost = pl.CostEstimate(
        flops=2 * B * (f_tot * n_pad * n_pad + four_o * f_tot * n_pad),
        transcendentals=5 * B * o_pad * n_pad,
        bytes_accessed=itm * (x_flat.size + h_flat.size + adj.size
                              + w_x.size + w_h.size)
        + 4 * (c_flat.size + four_o + 2 * B * o_pad * n_pad),
    )

    grid_spec = pltpu.PrefetchScalarGridSpec(
        num_scalar_prefetch=0,
        grid=(num_tiles,),
        in_specs=[
            # x / h / weights: constant block index -> DMA'd once, stay resident.
            pl.BlockSpec((B * in_f_pad, n_pad), lambda j: (0, 0)),   # x (folded)
            pl.BlockSpec((B * o_pad, n_pad), lambda j: (0, 0)),      # h_cur (folded)
            pl.BlockSpec((B * o_pad, tn), lambda j: (0, j)),         # c_cur tile
            pl.BlockSpec((n_pad, tn), lambda j: (0, j)),             # adjacency column tile
            pl.BlockSpec((four_o, in_f_pad), lambda j: (0, 0)),      # W_x
            pl.BlockSpec((four_o, o_pad), lambda j: (0, 0)),         # W_h
            pl.BlockSpec((four_o, 1), lambda j: (0, 0)),             # bias
        ],
        out_specs=[
            pl.BlockSpec((B * o_pad, tn), lambda j: (0, j)),         # h_next tile
            pl.BlockSpec((B * o_pad, tn), lambda j: (0, j)),         # c_next tile
        ],
    )

    h_next, c_next = pl.pallas_call(
        kernel,
        out_shape=(
            jax.ShapeDtypeStruct((B * o_pad, n_pad), f32),
            jax.ShapeDtypeStruct((B * o_pad, n_pad), f32),
        ),
        grid_spec=grid_spec,
        compiler_params=pltpu.CompilerParams(
            # Node tiles are independent -> parallel (shards across v7x's 2 TCs).
            dimension_semantics=("parallel",),
            vmem_limit_bytes=48 * 1024 * 1024,   # headroom under v7x 64 MiB
        ),
        cost_estimate=cost,
    )(x_flat, h_flat, c_flat, adj, w_x, w_h, b2d)

    h_next = h_next.reshape(B, o_pad, n_pad)[:, :out_f, :N]
    c_next = c_next.reshape(B, o_pad, n_pad)[:, :out_f, :N]
    return h_next, c_next


# ---------------------------------------------------------------------------
# Fused-time-loop kernel: grid=(T,), h/c carried in VMEM scratch, adjacency /
# weights / bias DMA'd once for the whole sequence.
# ---------------------------------------------------------------------------
def _gcnlstm_seq_kernel(x_ref, h0_ref, c0_ref, adj_ref, wx_ref, wh_ref, b_ref,
                        hs_ref, cs_ref, h_state, c_state,
                        *, batch, in_f_pad, o_pad, mm_dtype):
    four_o = 4 * o_pad
    n_pad = adj_ref.shape[1]
    t = pl.program_id(0)

    @pl.when(t == 0)
    def _():
        h_state[...] = h0_ref[...]
        c_state[...] = c0_ref[...]

    adj = adj_ref[...]                                               # (n_pad, n_pad)
    agg_x = jnp.dot(x_ref[0], adj, preferred_element_type=jnp.float32)
    agg_h = jnp.dot(h_state[...].astype(mm_dtype), adj,
                    preferred_element_type=jnp.float32)

    wx = wx_ref[...]
    wh = wh_ref[...]
    bias = jnp.broadcast_to(b_ref[...], (four_o, n_pad))

    for b in range(batch):                                           # static, small B
        ax = agg_x[b * in_f_pad:(b + 1) * in_f_pad].astype(mm_dtype)
        ah = agg_h[b * o_pad:(b + 1) * o_pad].astype(mm_dtype)
        gates = (jnp.dot(wx, ax, preferred_element_type=jnp.float32)
                 + jnp.dot(wh, ah, preferred_element_type=jnp.float32)
                 + bias)

        i = jax.nn.sigmoid(gates[0 * o_pad:1 * o_pad])
        f = jax.nn.sigmoid(gates[1 * o_pad:2 * o_pad])
        o = jax.nn.sigmoid(gates[2 * o_pad:3 * o_pad])
        g = jnp.tanh(gates[3 * o_pad:4 * o_pad])

        c_cur = c_state[pl.ds(b * o_pad, o_pad), :]
        c_next = f * c_cur + i * g
        h_next = o * jnp.tanh(c_next)

        h_state[pl.ds(b * o_pad, o_pad), :] = h_next
        c_state[pl.ds(b * o_pad, o_pad), :] = c_next

    hs_ref[0] = h_state[...]
    cs_ref[0] = c_state[...]


def gcnlstm_sequence(x_seq, adjacency, h0, c0, weight, bias,
                     matmul_dtype=jnp.float32):
    """Run the cell over a whole sequence inside one pallas_call.

    x_seq : (T, B, in_f, N);  h0, c0 : (B, out_f, N)
    returns (h_seq, c_seq), each (T, B, out_f, N) float32
    """
    T, B, in_f, N = x_seq.shape
    out_f = h0.shape[1]
    f32 = jnp.float32
    mm = matmul_dtype

    adj, w_x, w_h, b2d, n_pad, in_f_pad, o_pad = _prepare_static(
        adjacency, weight, bias, in_f, out_f, mm)
    four_o = 4 * o_pad

    x_flat = jnp.pad(x_seq.astype(f32),
                     ((0, 0), (0, 0), (0, in_f_pad - in_f), (0, n_pad - N)))
    x_flat = x_flat.reshape(T, B * in_f_pad, n_pad).astype(mm)
    h0_flat = _pad_fold(h0.astype(f32), o_pad, n_pad)
    c0_flat = _pad_fold(c0.astype(f32), o_pad, n_pad)

    kernel = functools.partial(_gcnlstm_seq_kernel, batch=B,
                               in_f_pad=in_f_pad, o_pad=o_pad, mm_dtype=mm)

    grid_spec = pltpu.PrefetchScalarGridSpec(
        num_scalar_prefetch=0,
        grid=(T,),
        in_specs=[
            pl.BlockSpec((1, B * in_f_pad, n_pad), lambda t: (t, 0, 0)),  # x_t
            pl.BlockSpec((B * o_pad, n_pad), lambda t: (0, 0)),           # h0
            pl.BlockSpec((B * o_pad, n_pad), lambda t: (0, 0)),           # c0
            pl.BlockSpec((n_pad, n_pad), lambda t: (0, 0)),               # adjacency (once)
            pl.BlockSpec((four_o, in_f_pad), lambda t: (0, 0)),           # W_x (once)
            pl.BlockSpec((four_o, o_pad), lambda t: (0, 0)),              # W_h (once)
            pl.BlockSpec((four_o, 1), lambda t: (0, 0)),                  # bias (once)
        ],
        out_specs=[
            pl.BlockSpec((1, B * o_pad, n_pad), lambda t: (t, 0, 0)),     # h_t
            pl.BlockSpec((1, B * o_pad, n_pad), lambda t: (t, 0, 0)),     # c_t
        ],
        scratch_shapes=[
            pltpu.VMEM((B * o_pad, n_pad), f32),    # resident h state
            pltpu.VMEM((B * o_pad, n_pad), f32),    # resident c state
        ],
    )

    h_seq, c_seq = pl.pallas_call(
        kernel,
        out_shape=(
            jax.ShapeDtypeStruct((T, B * o_pad, n_pad), f32),
            jax.ShapeDtypeStruct((T, B * o_pad, n_pad), f32),
        ),
        grid_spec=grid_spec,
        compiler_params=pltpu.CompilerParams(
            dimension_semantics=("arbitrary",),     # state carried across steps
            vmem_limit_bytes=48 * 1024 * 1024,
        ),
    )(x_flat, h0_flat, c0_flat, adj, w_x, w_h, b2d)

    h_seq = h_seq.reshape(T, B, o_pad, n_pad)[:, :, :out_f, :N]
    c_seq = c_seq.reshape(T, B, o_pad, n_pad)[:, :, :out_f, :N]
    return h_seq, c_seq


# ---------------------------------------------------------------------------
# Pure-JAX reference (matches the spec module with the assumed GCN)
# ---------------------------------------------------------------------------
def gcnlstm_cell_ref(node_features, adjacency, h_cur, c_cur, weight, bias):
    combined = jnp.concatenate([node_features, h_cur], axis=1)          # (B,F,N)
    support = jnp.einsum('gf,bfn->bgn', weight, combined)               # (B,4O,N)
    gates = jnp.einsum('bgn,nm->bgm', support, adjacency) + bias[None, :, None]
    cc_i, cc_f, cc_o, cc_g = jnp.split(gates, 4, axis=1)
    i = jax.nn.sigmoid(cc_i)
    f = jax.nn.sigmoid(cc_f)
    o = jax.nn.sigmoid(cc_o)
    g = jnp.tanh(cc_g)
    c_next = f * c_cur + i * g
    h_next = o * jnp.tanh(c_next)
    return h_next, c_next


if __name__ == "__main__":
    B = 2            # batch
    IN_F = 4         # in_feature
    OUT_F = 8        # out_feature
    N = 16           # graph nodes (273 in the original; small here)
    T = 4            # sequence length for the fused-time-loop variant

    key = jax.random.PRNGKey(0)
    kx, kh, kc, ka, kw, kb, ks = jax.random.split(key, 7)

    x = jax.random.normal(kx, (B, IN_F, N), dtype=jnp.float32)
    h_cur = jax.random.normal(kh, (B, OUT_F, N), dtype=jnp.float32)
    c_cur = jax.random.normal(kc, (B, OUT_F, N), dtype=jnp.float32)

    a_raw = jax.random.uniform(ka, (N, N), dtype=jnp.float32)
    adj = (a_raw + a_raw.T) * 0.5 / N                 # symmetric, ~row-normalized

    weight = jax.random.normal(kw, (4 * OUT_F, IN_F + OUT_F),
                               dtype=jnp.float32) * 0.1
    bias = jax.random.normal(kb, (4 * OUT_F,), dtype=jnp.float32) * 0.1

    # --- single step, f32 matmuls (faithful to the f32 module) -------------
    h1, c1 = gcnlstm_cell(x, adj, h_cur, c_cur, weight, bias)
    jax.block_until_ready((h1, c1))
    h1_ref, c1_ref = gcnlstm_cell_ref(x, adj, h_cur, c_cur, weight, bias)
    assert h1.shape == h1_ref.shape and c1.shape == c1_ref.shape
    assert jnp.allclose(h1, h1_ref, atol=1e-4, rtol=1e-4), \
        float(jnp.max(jnp.abs(h1 - h1_ref)))
    assert jnp.allclose(c1, c1_ref, atol=1e-4, rtol=1e-4), \
        float(jnp.max(jnp.abs(c1 - c1_ref)))

    # --- single step, bf16 MXU operands (v5e/v6e/v7x native path) ----------
    h1b, c1b = gcnlstm_cell(x, adj, h_cur, c_cur, weight, bias,
                            matmul_dtype=jnp.bfloat16)
    jax.block_until_ready((h1b, c1b))
    assert jnp.allclose(h1b, h1_ref, atol=3e-2, rtol=3e-2), \
        float(jnp.max(jnp.abs(h1b - h1_ref)))
    assert jnp.allclose(c1b, c1_ref, atol=3e-2, rtol=3e-2), \
        float(jnp.max(jnp.abs(c1b - c1_ref)))

    # --- fused time loop: adjacency/weights loaded once, h/c in VMEM -------
    x_seq = jax.random.normal(ks, (T, B, IN_F, N), dtype=jnp.float32)
    hs, cs = gcnlstm_sequence(x_seq, adj, h_cur, c_cur, weight, bias)
    jax.block_until_ready((hs, cs))
    h_r, c_r = h_cur, c_cur
    for t in range(T):
        h_r, c_r = gcnlstm_cell_ref(x_seq[t], adj, h_r, c_r, weight, bias)
        assert jnp.allclose(hs[t], h_r, atol=1e-4, rtol=1e-4), \
            (t, float(jnp.max(jnp.abs(hs[t] - h_r))))
        assert jnp.allclose(cs[t], c_r, atol=1e-4, rtol=1e-4), \
            (t, float(jnp.max(jnp.abs(cs[t] - c_r))))

    print("KERNEL_OK")
</pallas_src>

<mosaic_0001>
module attributes {stable_mosaic.version = 11 : i64} {
  func.func @_gcnlstm_cell_kernel(%arg0: i32, %arg1: memref<16x128xf32, #tpu.memory_space<vmem>>, %arg2: memref<16x128xf32, #tpu.memory_space<vmem>>, %arg3: memref<16x128xf32, #tpu.memory_space<vmem>>, %arg4: memref<128x128xf32, #tpu.memory_space<vmem>>, %arg5: memref<32x8xf32, #tpu.memory_space<vmem>>, %arg6: memref<32x8xf32, #tpu.memory_space<vmem>>, %arg7: memref<32x1xf32, #tpu.memory_space<vmem>>, %arg8: memref<16x128xf32, #tpu.memory_space<vmem>>, %arg9: memref<16x128xf32, #tpu.memory_space<vmem>>) attributes {dimension_semantics = [#tpu.dimension_semantics<parallel>], iteration_bounds = array<i64: 1>, scalar_prefetch = 0 : i64, scratch_operands = 0 : i64, tpu.core_type = #tpu.core_type<tc>, window_params = [{pipeline_mode = #tpu.pipeline_mode<synchronous>, transform_indices = @transform_0, window_bounds = array<i64: 16, 128>}, {pipeline_mode = #tpu.pipeline_mode<synchronous>, transform_indices = @transform_1, window_bounds = array<i64: 16, 128>}, {transform_indices = @transform_2, window_bounds = array<i64: 16, 128>}, {transform_indices = @transform_3, window_bounds = array<i64: 128, 128>}, {pipeline_mode = #tpu.pipeline_mode<synchronous>, transform_indices = @transform_4, window_bounds = array<i64: 32, 8>}, {pipeline_mode = #tpu.pipeline_mode<synchronous>, transform_indices = @transform_5, window_bounds = array<i64: 32, 8>}, {pipeline_mode = #tpu.pipeline_mode<synchronous>, transform_indices = @transform_6, window_bounds = array<i64: 32, 1>}, {transform_indices = @transform_7, window_bounds = array<i64: 16, 128>}, {transform_indices = @transform_8, window_bounds = array<i64: 16, 128>}]} {
    %c0 = arith.constant 0 : index
    %c0_0 = arith.constant 0 : index
    %0 = vector.load %arg4[%c0, %c0_0] : memref<128x128xf32, #tpu.memory_space<vmem>>, vector<128x128xf32>
    %c0_1 = arith.constant 0 : index
    %c0_2 = arith.constant 0 : index
    %1 = vector.load %arg1[%c0_1, %c0_2] : memref<16x128xf32, #tpu.memory_space<vmem>>, vector<16x128xf32>
    %cst = arith.constant dense<0.000000e+00> : vector<16x128xf32>
    %2 = tpu.matmul %1, %0, %cst {dimension_numbers = #tpu.dot_dimension_numbers<[1], [0], [0], [1], [0, 0, 1, 1], [], []>} : vector<16x128xf32>, vector<128x128xf32>, vector<16x128xf32> -> vector<16x128xf32>
    %c0_3 = arith.constant 0 : index
    %c0_4 = arith.constant 0 : index
    %3 = vector.load %arg2[%c0_3, %c0_4] : memref<16x128xf32, #tpu.memory_space<vmem>>, vector<16x128xf32>
    %cst_5 = arith.constant dense<0.000000e+00> : vector<16x128xf32>
    %4 = tpu.matmul %3, %0, %cst_5 {dimension_numbers = #tpu.dot_dimension_numbers<[1], [0], [0], [1], [0, 0, 1, 1], [], []>} : vector<16x128xf32>, vector<128x128xf32>, vector<16x128xf32> -> vector<16x128xf32>
    %c0_6 = arith.constant 0 : index
    %c0_7 = arith.constant 0 : index
    %5 = vector.load %arg5[%c0_6, %c0_7] : memref<32x8xf32, #tpu.memory_space<vmem>>, vector<32x8xf32>
    %c0_8 = arith.constant 0 : index
    %c0_9 = arith.constant 0 : index
    %6 = vector.load %arg6[%c0_8, %c0_9] : memref<32x8xf32, #tpu.memory_space<vmem>>, vector<32x8xf32>
    %c0_10 = arith.constant 0 : index
    %c0_11 = arith.constant 0 : index
    %7 = vector.load %arg7[%c0_10, %c0_11] : memref<32x1xf32, #tpu.memory_space<vmem>>, vector<32x1xf32>
    %8 = vector.shape_cast %7 : vector<32x1xf32> to vector<32x1xf32>
    %9 = vector.broadcast %8 : vector<32x1xf32> to vector<32x128xf32>
    %10 = vector.extract_strided_slice %2 {offsets = [0, 0], sizes = [8, 128], strides = [1, 1]} : vector<16x128xf32> to vector<8x128xf32>
    %11 = vector.extract_strided_slice %4 {offsets = [0, 0], sizes = [8, 128], strides = [1, 1]} : vector<16x128xf32> to vector<8x128xf32>
    %cst_12 = arith.constant dense<0.000000e+00> : vector<32x128xf32>
    %12 = tpu.matmul %5, %10, %cst_12 {dimension_numbers = #tpu.dot_dimension_numbers<[1], [0], [0], [1], [0, 0, 1, 1], [], []>} : vector<32x8xf32>, vector<8x128xf32>, vector<32x128xf32> -> vector<32x128xf32>
    %cst_13 = arith.constant dense<0.000000e+00> : vector<32x128xf32>
    %13 = tpu.matmul %6, %11, %cst_13 {dimension_numbers = #tpu.dot_dimension_numbers<[1], [0], [0], [1], [0, 0, 1, 1], [], []>} : vector<32x8xf32>, vector<8x128xf32>, vector<32x128xf32> -> vector<32x128xf32>
    %14 = arith.addf %12, %13 : vector<32x128xf32>
    %15 = arith.addf %14, %9 : vector<32x128xf32>
    %16 = vector.extract_strided_slice %15 {offsets = [0, 0], sizes = [8, 128], strides = [1, 1]} : vector<32x128xf32> to vector<8x128xf32>
    %17 = arith.negf %16 : vector<8x128xf32>
    %18 = math.exp %17 : vector<8x128xf32>
    %cst_14 = arith.constant 1.000000e+00 : f32
    %19 = vector.broadcast %cst_14 : f32 to vector<8x128xf32>
    %20 = arith.addf %19, %18 : vector<8x128xf32>
    %21 = arith.divf %19, %20 : vector<8x128xf32>
    %22 = vector.extract_strided_slice %15 {offsets = [8, 0], sizes = [8, 128], strides = [1, 1]} : vector<32x128xf32> to vector<8x128xf32>
    %23 = arith.negf %22 : vector<8x128xf32>
    %24 = math.exp %23 : vector<8x128xf32>
    %cst_15 = arith.constant 1.000000e+00 : f32
    %25 = vector.broadcast %cst_15 : f32 to vector<8x128xf32>
    %26 = arith.addf %25, %24 : vector<8x128xf32>
    %27 = arith.divf %25, %26 : vector<8x128xf32>
    %28 = vector.extract_strided_slice %15 {offsets = [16, 0], sizes = [8, 128], strides = [1, 1]} : vector<32x128xf32> to vector<8x128xf32>
    %29 = arith.negf %28 : vector<8x128xf32>
    %30 = math.exp %29 : vector<8x128xf32>
    %cst_16 = arith.constant 1.000000e+00 : f32
    %31 = vector.broadcast %cst_16 : f32 to vector<8x128xf32>
    %32 = arith.addf %31, %30 : vector<8x128xf32>
    %33 = arith.divf %31, %32 : vector<8x128xf32>
    %34 = vector.extract_strided_slice %15 {offsets = [24, 0], sizes = [8, 128], strides = [1, 1]} : vector<32x128xf32> to vector<8x128xf32>
    %35 = math.tanh %34 : vector<8x128xf32>
    %c0_17 = arith.constant 0 : index
    %c0_18 = arith.constant 0 : index
    %36 = vector.load %arg3[%c0_17, %c0_18] : memref<16x128xf32, #tpu.memory_space<vmem>>, vector<8x128xf32>
    %37 = arith.mulf %27, %36 : vector<8x128xf32>
    %38 = arith.mulf %21, %35 : vector<8x128xf32>
    %39 = arith.addf %37, %38 : vector<8x128xf32>
    %40 = math.tanh %39 : vector<8x128xf32>
    %41 = arith.mulf %33, %40 : vector<8x128xf32>
    %c0_19 = arith.constant 0 : index
    %c0_20 = arith.constant 0 : index
    %42 = vector.load %arg8[%c0_19, %c0_20] : memref<16x128xf32, #tpu.memory_space<vmem>>, vector<8x128xf32>
    tpu.vector_store %arg8[%c0_19, %c0_20], %41 {strides = array<i32>} : memref<16x128xf32, #tpu.memory_space<vmem>>, vector<8x128xf32>,
    %c0_21 = arith.constant 0 : index
    %c0_22 = arith.constant 0 : index
    %43 = vector.load %arg9[%c0_21, %c0_22] : memref<16x128xf32, #tpu.memory_space<vmem>>, vector<8x128xf32>
    tpu.vector_store %arg9[%c0_21, %c0_22], %39 {strides = array<i32>} : memref<16x128xf32, #tpu.memory_space<vmem>>, vector<8x128xf32>,
    %44 = vector.extract_strided_slice %2 {offsets = [8, 0], sizes = [8, 128], strides = [1, 1]} : vector<16x128xf32> to vector<8x128xf32>
    %45 = vector.extract_strided_slice %4 {offsets = [8, 0], sizes = [8, 128], strides = [1, 1]} : vector<16x128xf32> to vector<8x128xf32>
    %cst_23 = arith.constant dense<0.000000e+00> : vector<32x128xf32>
    %46 = tpu.matmul %5, %44, %cst_23 {dimension_numbers = #tpu.dot_dimension_numbers<[1], [0], [0], [1], [0, 0, 1, 1], [], []>} : vector<32x8xf32>, vector<8x128xf32>, vector<32x128xf32> -> vector<32x128xf32>
    %cst_24 = arith.constant dense<0.000000e+00> : vector<32x128xf32>
    %47 = tpu.matmul %6, %45, %cst_24 {dimension_numbers = #tpu.dot_dimension_numbers<[1], [0], [0], [1], [0, 0, 1, 1], [], []>} : vector<32x8xf32>, vector<8x128xf32>, vector<32x128xf32> -> vector<32x128xf32>
    %48 = arith.addf %46, %47 : vector<32x128xf32>
    %49 = arith.addf %48, %9 : vector<32x128xf32>
    %50 = vector.extract_strided_slice %49 {offsets = [0, 0], sizes = [8, 128], strides = [1, 1]} : vector<32x128xf32> to vector<8x128xf32>
    %51 = arith.negf %50 : vector<8x128xf32>
    %52 = math.exp %51 : vector<8x128xf32>
    %cst_25 = arith.constant 1.000000e+00 : f32
    %53 = vector.broadcast %cst_25 : f32 to vector<8x128xf32>
    %54 = arith.addf %53, %52 : vector<8x128xf32>
    %55 = arith.divf %53, %54 : vector<8x128xf32>
    %56 = vector.extract_strided_slice %49 {offsets = [8, 0], sizes = [8, 128], strides = [1, 1]} : vector<32x128xf32> to vector<8x128xf32>
    %57 = arith.negf %56 : vector<8x128xf32>
    %58 = math.exp %57 : vector<8x128xf32>
    %cst_26 = arith.constant 1.000000e+00 : f32
    %59 = vector.broadcast %cst_26 : f32 to vector<8x128xf32>
    %60 = arith.addf %59, %58 : vector<8x128xf32>
    %61 = arith.divf %59, %60 : vector<8x128xf32>
    %62 = vector.extract_strided_slice %49 {offsets = [16, 0], sizes = [8, 128], strides = [1, 1]} : vector<32x128xf32> to vector<8x128xf32>
    %63 = arith.negf %62 : vector<8x128xf32>
    %64 = math.exp %63 : vector<8x128xf32>
    %cst_27 = arith.constant 1.000000e+00 : f32
    %65 = vector.broadcast %cst_27 : f32 to vector<8x128xf32>
    %66 = arith.addf %65, %64 : vector<8x128xf32>
    %67 = arith.divf %65, %66 : vector<8x128xf32>
    %68 = vector.extract_strided_slice %49 {offsets = [24, 0], sizes = [8, 128], strides = [1, 1]} : vector<32x128xf32> to vector<8x128xf32>
    %69 = math.tanh %68 : vector<8x128xf32>
    %c8 = arith.constant 8 : index
    %c0_28 = arith.constant 0 : index
    %70 = vector.load %arg3[%c8, %c0_28] : memref<16x128xf32, #tpu.memory_space<vmem>>, vector<8x128xf32>
    %71 = arith.mulf %61, %70 : vector<8x128xf32>
    %72 = arith.mulf %55, %69 : vector<8x128xf32>
    %73 = arith.addf %71, %72 : vector<8x128xf32>
    %74 = math.tanh %73 : vector<8x128xf32>
    %75 = arith.mulf %67, %74 : vector<8x128xf32>
    %c8_29 = arith.constant 8 : index
    %c0_30 = arith.constant 0 : index
    %76 = vector.load %arg8[%c8_29, %c0_30] : memref<16x128xf32, #tpu.memory_space<vmem>>, vector<8x128xf32>
    tpu.vector_store %arg8[%c8_29, %c0_30], %75 {strides = array<i32>} : memref<16x128xf32, #tpu.memory_space<vmem>>, vector<8x128xf32>,
    %c8_31 = arith.constant 8 : index
    %c0_32 = arith.constant 0 : index
    %77 = vector.load %arg9[%c8_31, %c0_32] : memref<16x128xf32, #tpu.memory_space<vmem>>, vector<8x128xf32>
    tpu.vector_store %arg9[%c8_31, %c0_32], %73 {strides = array<i32>} : memref<16x128xf32, #tpu.memory_space<vmem>>, vector<8x128xf32>,
    return
  }
  func.func @transform_0(%arg0: i32) -> (i32, i32) {
    %c0_i32 = arith.constant 0 : i32
    %c0_i32_0 = arith.constant 0 : i32
    %c0_i32_1 = arith.constant 0 : i32
    return %c0_i32, %c0_i32_0 : i32, i32
  }
  func.func @transform_1(%arg0: i32) -> (i32, i32) {
    %c0_i32 = arith.constant 0 : i32
    %c0_i32_0 = arith.constant 0 : i32
    %c0_i32_1 = arith.constant 0 : i32
    return %c0_i32, %c0_i32_0 : i32, i32
  }
  func.func @transform_2(%arg0: i32) -> (i32, i32) {
    %c0_i32 = arith.constant 0 : i32
    %c0_i32_0 = arith.constant 0 : i32
    return %c0_i32, %arg0 : i32, i32
  }
  func.func @transform_3(%arg0: i32) -> (i32, i32) {
    %c0_i32 = arith.constant 0 : i32
    %c0_i32_0 = arith.constant 0 : i32
    return %c0_i32, %arg0 : i32, i32
  }
  func.func @transform_4(%arg0: i32) -> (i32, i32) {
    %c0_i32 = arith.constant 0 : i32
    %c0_i32_0 = arith.constant 0 : i32
    %c0_i32_1 = arith.constant 0 : i32
    return %c0_i32, %c0_i32_0 : i32, i32
  }
  func.func @transform_5(%arg0: i32) -> (i32, i32) {
    %c0_i32 = arith.constant 0 : i32
    %c0_i32_0 = arith.constant 0 : i32
    %c0_i32_1 = arith.constant 0 : i32
    return %c0_i32, %c0_i32_0 : i32, i32
  }
  func.func @transform_6(%arg0: i32) -> (i32, i32) {
    %c0_i32 = arith.constant 0 : i32
    %c0_i32_0 = arith.constant 0 : i32
    %c0_i32_1 = arith.constant 0 : i32
    return %c0_i32, %c0_i32_0 : i32, i32
  }
  func.func @transform_7(%arg0: i32) -> (i32, i32) {
    %c0_i32 = arith.constant 0 : i32
    %c0_i32_0 = arith.constant 0 : i32
    return %c0_i32, %arg0 : i32, i32
  }
  func.func @transform_8(%arg0: i32) -> (i32, i32) {
    %c0_i32 = arith.constant 0 : i32
    %c0_i32_0 = arith.constant 0 : i32
    return %c0_i32, %arg0 : i32, i32
  }
}

</mosaic_0001>

<bundles_post_ra>
// kernel: tpu_custom_call.1
= control target key start
LH: loop header
LB: loop body
LE: loop exit
PB: predicated region body
PF: predicated region fallthrough
CT: control target
= control target key end

     0   :  { %14 = vsyncpa [#allocation3], 0  ;;  %s1236_s0 = inlined_call_operand.vmem [shape: f32[16,128], index: 0, kind: input, shape index: {}]   ;;  %s1237_s1 = inlined_call_operand.vmem [shape: f32[16,128], index: 1, kind: input, shape index: {}]   ;;  %s1238_s2 = inlined_call_operand.vmem [shape: f32[16,128], index: 2, kind: input, shape index: {}]   ;;  %s1239_s3 = inlined_call_operand.hbm [shape: f32[128,128], index: 3, kind: input, shape index: {}]   ;;  %s1240_s4 = inlined_call_operand.vmem [shape: f32[32,8], index: 4, kind: input, shape index: {}]   ;;  %s1241_s5 = inlined_call_operand.vmem [shape: f32[32,8], index: 5, kind: input, shape index: {}]   ;;  %s1242_s6 = inlined_call_operand.vmem [shape: f32[32,1], index: 6, kind: input, shape index: {}]   ;;  %s1243_s7 = inlined_call_operand.hbm [shape: f32[16,128], index: 7, kind: output, shape index: {0}]   ;;  %s1244_s8 = inlined_call_operand.hbm [shape: f32[16,128], index: 8, kind: output, shape index: {1}]  }
   0x1   :  { %15 = vsyncpa [#allocation4], 0 }
   0x2   :  { %16 = vsyncpa [#allocation7], 0  ;;  %s1070_s27 = smov [#allocation2]   ;;  %s998_s9 = scalar_lea.hbm %s1239_s3, 2048 }
   0x3   :  { %s28_s28 = sshll.u32 %s1070_s27, 4  ;;  %p999_p0 = scmp.ne.s32.totalorder %s1239_s3, %s998_s9  ;;  %s29_s28 = int_to_ptr.vmem [resolvable:$true] %s28_s28 }
   0x4   :  { %p1002_p1 = scmp.lt.u32.totalorder %s998_s9, %s1239_s3 }
   0x6   :  { %p1004_p2 = pnand %p1002_p1, %p999_p0 }
   0x8   :  { %1007 = shalt.err (!%p1004_p2)
}
   0x9   :  { %s1008_s14 = scalar_lea.vmem %s29_s28, 2048  ;;  %p1013_p4 = scmp.lt.s32.totalorder %s29_s28, %s29_s28 }
   0xa   :  { %p1009_p3 = scmp.ne.s32.totalorder %s29_s28, %s1008_s14  ;;  %p1014_p5 = scmp.lt.s32.totalorder %s1008_s14, %s1008_s14 }
   0xc   :  { %p1015_p6 = por %p1014_p5, %p1013_p4 }
   0xe   :  { %p1016_p7 = pnand %p1015_p6, %p1009_p3 }
  0x10   :  { %1019 = shalt.err (!%p1016_p7)
}
  0x11   :  { %s1071_s15 = smov 128   ;;  %s1072_s16 = smov 8  }
  0x12   :  { %34 = dma.hbm_to_vmem [thread:$0]  %s1239_s3, 2048, %s29_s28, [#allocation3], %s1071_s15, %s1071_s15, %s1072_s16  }
  0x13   :  { %1064 = dma.done.wait [#allocation3], 2048  }
  0x14   :  { %1065 = vsyncadd [#allocation3], 4294965248  ;;  %v44_v0 = vld [vmem:[#allocation2] sm:$0xff]  ;;  %v45_v1 = vld [vmem:[#allocation2 + $0x8] sm:$0xff]  ;;  %vm246_vm0 = vcmask 64512   ;;  %v1073_v31 = vmov 0  }
  0x15   :  { %v46_v2 = vld [vmem:[#allocation2 + $0x10] sm:$0xff]  ;;  %v886_v3 = vpack.c.bf16 %v45_v1, %v44_v0  ;;  %v47_v4 = vld [vmem:[#allocation2 + $0x18] sm:$0xff]  ;;  %v48_v6 = vld [vmem:[#allocation2 + $0x20] sm:$0xff]  ;;  %964 = vset.pattern.permute.xlu0 %v1073_v31  ;;  %965 = vset.pattern.permute.xlu1 %v1073_v31  ;;  %s1074_s28 = smov [#allocation6]  }
  0x16   :  { %v890_v5 = vpack.c.bf16 %v47_v4, %v46_v2  ;;  %v49_v7 = vld [vmem:[#allocation2 + $0x28] sm:$0xff]  ;;  %v137_v9 = vld [vmem:[%s1237_s1] sm:$0xff]  ;;  %v50_v10 = vld [vmem:[#allocation2 + $0x30] sm:$0xff]  ;;  %s690_s29 = sshll.u32 %s1074_s28, 4  ;;  %s691_s29 = int_to_ptr.vmem [resolvable:$true] %s690_s29 }
  0x17   :  { %919 = vmatprep.subr.bf16.mxu1 %v886_v3  ;;  %887 = vmatprep.subr.bf16.mxu0 %v886_v3  ;;  %v894_v8 = vpack.c.bf16 %v49_v7, %v48_v6  ;;  %v51_v11 = vld [vmem:[#allocation2 + $0x38] sm:$0xff]  ;;  %v60_v12 = vld [vmem:[%s1236_s0] sm:$0xff]  ;;  %v53_v15 = vld [vmem:[#allocation2 + $0x48] sm:$0xff]  ;;  %p1025_p9 = scmp.lt.s32.totalorder %s691_s29, %s691_s29 }
  0x18   :  { %921 = vmatpush3.bf16.msra.mxu1 %v886_v3  ;;  %889 = vmatpush3.bf16.msra.mxu0 %v886_v3  ;;  %v898_v13 = vpack.c.bf16 %v51_v11, %v50_v10  ;;  %v52_v14 = vld [vmem:[#allocation2 + $0x40] sm:$0xff]  ;;  %v54_v17 = vld [vmem:[#allocation2 + $0x50] sm:$0xff]  ;;  %v55_v18 = vld [vmem:[#allocation2 + $0x58] sm:$0xff] }
  0x19   :  { %923 = vmatprep.subr.bf16.mxu1 %v890_v5  ;;  %891 = vmatprep.subr.bf16.mxu0 %v890_v5  ;;  %v902_v16 = vpack.c.bf16 %v53_v15, %v52_v14  ;;  %v906_v19 = vpack.c.bf16 %v55_v18, %v54_v17  ;;  %v56_v20 = vld [vmem:[#allocation2 + $0x60] sm:$0xff]  ;;  %v57_v21 = vld [vmem:[#allocation2 + $0x68] sm:$0xff]  ;;  %v58_v23 = vld [vmem:[#allocation2 + $0x70] sm:$0xff] }
  0x1a   :  { %851 = vmatprep.mubr.f32.mxu1 %v137_v9  ;;  %816 = vmatprep.mubr.f32.mxu0 %v60_v12  ;;  %v910_v22 = vpack.c.bf16 %v57_v21, %v56_v20  ;;  %v59_v24 = vld [vmem:[#allocation2 + $0x78] sm:$0xff]  ;;  %v138_v26 = vld [vmem:[%s1237_s1 + $0x8] sm:$0xff]  ;;  %v218_v28 = vld [vmem:[%s1241_s5] sm:$0xff] }
  0x1b   :  { %v914_v25 = vpack.c.bf16 %v59_v24, %v58_v23  ;;  %v61_v27 = vld [vmem:[%s1236_s0 + $0x8] sm:$0xff]  ;;  %v222_v29 = vld [vmem:[%s1242_s6] sm:$0xff]  ;;  %v224_v30 = vld [vmem:[%s1242_s6 + $0x10] sm:$0xff] }
  0x1c   :  { %925 = vmatpush3.bf16.msra.mxu1 %v890_v5  ;;  %893 = vmatpush3.bf16.msra.mxu0 %v890_v5  ;;  %v223_v32 = vld [vmem:[%s1242_s6 + $0x8] sm:$0xff]  ;;  %v225_v33 = vld [vmem:[%s1242_s6 + $0x18] sm:$0xff]  ;;  %v220_v39 = vld [vmem:[%s1241_s5 + $0x10] sm:$0xff] }
  0x1d   :  { %927 = vmatprep.subr.bf16.mxu1 %v894_v8  ;;  %895 = vmatprep.subr.bf16.mxu0 %v894_v8  ;;  %v219_v36 = vld [vmem:[%s1241_s5 + $0x8] sm:$0xff]  ;;  %v221_v40 = vld [vmem:[%s1241_s5 + $0x18] sm:$0xff]  ;;  %v214_v41 = vld [vmem:[%s1240_s4] sm:$0xff] }
  0x1e   :  { %228 = vperm.xlu0 %964, %v222_v29   ;;  %238 = vperm.xlu1 %965, %v224_v30   ;;  %v215_v42 = vld [vmem:[%s1240_s4 + $0x8] sm:$0xff]  ;;  %v216_v43 = vld [vmem:[%s1240_s4 + $0x10] sm:$0xff]  ;;  %v217_v44 = vld [vmem:[%s1240_s4 + $0x18] sm:$0xff] }
  0x1f   :  { %v665_v18 = vld [vmem:[%s1238_s2 + $0x8] sm:$0xff]  ;;  %v464_v20 = vld [vmem:[%s1238_s2] sm:$0xff]  ;;  %s1020_s2 = scalar_lea.vmem %s691_s29, 256 }
  0x20   :  { %929 = vmatpush3.bf16.msra.mxu1 %v894_v8  ;;  %897 = vmatpush3.bf16.msra.mxu0 %v894_v8  ;;  %p1021_p8 = scmp.ne.s32.totalorder %s691_s29, %s1020_s2  ;;  %p1026_p10 = scmp.lt.s32.totalorder %s1020_s2, %s1020_s2 }
  0x21   :  { %931 = vmatprep.subr.bf16.mxu1 %v898_v13  ;;  %899 = vmatprep.subr.bf16.mxu0 %v898_v13 }
  0x22   :  { %233 = vperm.xlu0 %964, %v223_v32   ;;  %243 = vperm.xlu1 %965, %v225_v33   ;;  %p1027_p11 = por %p1026_p10, %p1025_p9 }
  0x24   :  { %933 = vmatpush3.bf16.msra.mxu1 %v898_v13  ;;  %901 = vmatpush3.bf16.msra.mxu0 %v898_v13  ;;  %p1028_p12 = pnand %p1027_p11, %p1021_p8 }
  0x25   :  { %935 = vmatprep.subr.bf16.mxu1 %v902_v16  ;;  %903 = vmatprep.subr.bf16.mxu0 %v902_v16 }
  0x28   :  { %937 = vmatpush3.bf16.msra.mxu1 %v902_v16  ;;  %905 = vmatpush3.bf16.msra.mxu0 %v902_v16 }
  0x29   :  { %939 = vmatprep.subr.bf16.mxu1 %v906_v19  ;;  %907 = vmatprep.subr.bf16.mxu0 %v906_v19 }
  0x2c   :  { %941 = vmatpush3.bf16.msra.mxu1 %v906_v19  ;;  %909 = vmatpush3.bf16.msra.mxu0 %v906_v19 }
  0x2d   :  { %943 = vmatprep.subr.bf16.mxu1 %v910_v22  ;;  %911 = vmatprep.subr.bf16.mxu0 %v910_v22 }
  0x30   :  { %945 = vmatpush3.bf16.msra.mxu1 %v910_v22  ;;  %913 = vmatpush3.bf16.msra.mxu0 %v910_v22 }
  0x31   :  { %947 = vmatprep.subr.bf16.mxu1 %v914_v25  ;;  %915 = vmatprep.subr.bf16.mxu0 %v914_v25 }
  0x34   :  { %949 = vmatpush3.bf16.msra.mxu1 %v914_v25  ;;  %917 = vmatpush3.bf16.msra.mxu0 %v914_v25 }
  0x37   :  { %852 = vmatmul.mubr.f32.vlgmr.msra.gmra.mrb[0].mxu1 %v138_v26  ;;  %817 = vmatmul.mubr.f32.vlgmr.msra.gmra.mrb[0].mxu0 %v61_v27 }
  0x38   :  { %872 = vmatprep.mubr.msk.f32.mxu1 %vm246_vm0, %v218_v28  ;;  %856 = vmatprep.mubr.msk.f32.mxu0 %vm246_vm0, %v218_v28 }
  0x9d   :  { %v229_v45 = vpop.permute.xlu0 %228  ;;  %v239_v46 = vpop.permute.xlu1 %238 }
  0xa1   :  { %v234_v47 = vpop.permute.xlu0 %233  ;;  %v244_v0 = vpop.permute.xlu1 %243 }
 0x10a   :  { %v853_v34 = vpop.f32.mrb[0].mxu1  ;;  %v818_v35 = vpop.f32.mrb[0].mxu0 }
 0x10b   :  { %v205_v37 = vpop.f32.mrb[1].mxu1  ;;  %870 = vmatprep.subr.mxu1 %v853_v34  ;;  %v128_v38 = vpop.f32.mrb[1].mxu0 }
 0x10c   :  { %854 = vmatprep.subr.mxu0 %v205_v37  ;;  %871 = vmatpush3.msra.mxu1 %v853_v34 }
 0x10d   :  { %855 = vmatpush3.msra.mxu0 %v205_v37  ;;  %873 = vmatmul.mubr.msk.f32.vlgmr.msra.gmra.mrb[2].mxu1 %vm246_vm0, %v219_v36 }
 0x10e   :  { %857 = vmatmul.mubr.msk.f32.vlgmr.msra.gmra.mrb[2].mxu0 %vm246_vm0, %v219_v36  ;;  %862 = vmatprep.subr.mxu0 %v128_v38 }
 0x10f   :  { %878 = vmatprep.subr.mxu1 %v818_v35  ;;  %863 = vmatpush3.msra.mxu0 %v128_v38 }
 0x110   :  { %879 = vmatpush3.msra.mxu1 %v818_v35  ;;  %875 = vmatprep.mubr.msk.f32.mxu1 %vm246_vm0, %v220_v39 }
 0x111   :  { %859 = vmatprep.mubr.msk.f32.mxu0 %vm246_vm0, %v220_v39  ;;  %876 = vmatmul.mubr.msk.f32.gmra.mrb[4].mxu1 %vm246_vm0, %v221_v40 }
 0x112   :  { %860 = vmatmul.mubr.msk.f32.gmra.mrb[4].mxu0 %vm246_vm0, %v221_v40  ;;  %880 = vmatprep.mubr.msk.f32.mxu1 %vm246_vm0, %v214_v41 }
 0x113   :  { %864 = vmatprep.mubr.msk.f32.mxu0 %vm246_vm0, %v214_v41 }
 0x115   :  { %881 = vmatmul.mubr.msk.f32.vlgmr.msra.gmra.mrb[2].mxu1 %vm246_vm0, %v215_v42 }
 0x116   :  { %865 = vmatmul.mubr.msk.f32.vlgmr.msra.gmra.mrb[2].mxu0 %vm246_vm0, %v215_v42  ;;  %883 = vmatprep.mubr.msk.f32.mxu1 %vm246_vm0, %v216_v43 }
 0x117   :  { %867 = vmatprep.mubr.msk.f32.mxu0 %vm246_vm0, %v216_v43 }
 0x119   :  { %884 = vmatmul.mubr.msk.f32.gmra.mrb[4].mxu1 %vm246_vm0, %v217_v44 }
 0x11a   :  { %868 = vmatmul.mubr.msk.f32.gmra.mrb[4].mxu0 %vm246_vm0, %v217_v44 }
 0x1e8   :  { %v882_v48 = vpop.f32.mrb[2].mxu1 }
 0x1e9   :  { %v643_v49 = vadd.f32 %v882_v48, %v234_v47  ;;  %v866_v50 = vpop.f32.mrb[2].mxu0  ;;  %v623_v51 = vpop.f32.mrb[3].mxu1 }
 0x1ea   :  { %v442_v52 = vadd.f32 %v866_v50, %v234_v47  ;;  %v642_v53 = vadd.f32 %v623_v51, %v229_v45  ;;  %v422_v54 = vpop.f32.mrb[3].mxu0 }
 0x1eb   :  { %v726_v55 = vmul.f32 -1.442695, %v643_v49  ;;  %v441_v56 = vadd.f32 %v422_v54, %v229_v45 }
 0x1ec   :  { %v715_v57 = vmul.f32 -1.442695, %v442_v52  ;;  %v725_v58 = vmul.f32 -1.442695, %v642_v53  ;;  %v885_v59 = vpop.f32.mrb[4].mxu1 }
 0x1ed   :  { %966 = vpow2.f32 %v726_v55  ;;  %v714_v60 = vmul.f32 -1.442695, %v441_v56  ;;  %v869_v61 = vpop.f32.mrb[4].mxu0  ;;  %v633_v62 = vpop.f32.mrb[5].mxu1  ;;  %v645_v3 = vadd.f32 %v885_v59, %v244_v0 }
 0x1ee   :  { %968 = vpow2.f32 %v715_v57  ;;  %v432_v63 = vpop.f32.mrb[5].mxu0  ;;  %v644_v1 = vadd.f32 %v633_v62, %v239_v46  ;;  %v444_v4 = vadd.f32 %v869_v61, %v244_v0 }
 0x1ef   :  { %970 = vpow2.f32 %v725_v58  ;;  %v443_v2 = vadd.f32 %v432_v63, %v239_v46 }
 0x1f0   :  { %972 = vpow2.f32 %v714_v60  ;;  %v727_v5 = vmul.f32 -1.442695, %v644_v1 }
 0x1f1   :  { %v716_v6 = vmul.f32 -1.442695, %v443_v2  ;;  %974 = vtanh.f32 %v645_v3 }
 0x1f2   :  { %976 = vtanh.f32 %v444_v4 }
 0x1f3   :  { %978 = vpow2.f32 %v727_v5 }
 0x1f4   :  { %980 = vpow2.f32 %v716_v6 }
 0x1f7   :  { %v967_v7 = vpop.eup %966 }
 0x1f8   :  { %v969_v8 = vpop.eup %968  ;;  %v655_v9 = vadd.f32 1.0, %v967_v7 }
 0x1f9   :  { %v971_v10 = vpop.eup %970  ;;  %v454_v11 = vadd.f32 1.0, %v969_v8 }
 0x1fa   :  { %v973_v12 = vpop.eup %972  ;;  %982 = vrcp.f32 %v655_v9  ;;  %v649_v13 = vadd.f32 1.0, %v971_v10 }
 0x1fb   :  { %984 = vrcp.f32 %v454_v11  ;;  %v448_v14 = vadd.f32 1.0, %v973_v12  ;;  %v975_v15 = vpop.eup %974 }
 0x1fc   :  { %986 = vrcp.f32 %v649_v13  ;;  %v977_v16 = vpop.eup %976 }
 0x1fd   :  { %988 = vrcp.f32 %v448_v14  ;;  %v979_v17 = vpop.eup %978 }
 0x1fe   :  { %v981_v19 = vpop.eup %980  ;;  %v661_v24 = vadd.f32 1.0, %v979_v17 }
 0x1ff   :  { %v460_v27 = vadd.f32 1.0, %v981_v19 }
 0x200   :  { %990 = vrcp.f32 %v661_v24 }
 0x201   :  { %992 = vrcp.f32 %v460_v27 }
 0x204   :  { %v983_v21 = vpop.eup %982 }
 0x205   :  { %v985_v22 = vpop.eup %984  ;;  %v666_v23 = vmul.f32 %v983_v21, %v665_v18 }
 0x206   :  { %v987_v25 = vpop.eup %986  ;;  %v465_v26 = vmul.f32 %v985_v22, %v464_v20 }
 0x207   :  { %v989_v28 = vpop.eup %988  ;;  %v667_v29 = vmul.f32 %v987_v25, %v975_v15 }
 0x208   :  { %v466_v30 = vmul.f32 %v989_v28, %v977_v16 }
 0x209   :  { %v668_v31 = vadd.f32 %v667_v29, %v666_v23 }
 0x20a   :  { %v467_v32 = vadd.f32 %v466_v30, %v465_v26 }
 0x20b   :  { %994 = vtanh.f32 %v668_v31  ;;  %672 = vst [vmem:[#allocation6 + $0x8] sm:$0xff] %v668_v31 }
 0x20c   :  { %996 = vtanh.f32 %v467_v32  ;;  %471 = vst [vmem:[#allocation6] sm:$0xff] %v467_v32 }
 0x20d   :  { %1031 = shalt.err (!%p1028_p12)
}
 0x20e   :  { %s1032_s0 = scalar_lea.hbm %s1244_s8, 256 }
 0x20f   :  { %p1033_p13 = scmp.ne.s32.totalorder %s1244_s8, %s1032_s0  ;;  %p1036_p0 = scmp.lt.u32.totalorder %s1032_s0, %s1244_s8 }
 0x211   :  { %p1038_p1 = pnand %p1036_p0, %p1033_p13 }
 0x213   :  { %1041 = shalt.err (!%p1038_p1)
}
 0x214   :  { %696 = dma.vmem_to_hbm [thread:$0]  %s691_s29, 256, %s1244_s8, [#allocation7], %s1071_s15, %s1071_s15, %s1072_s16   ;;  %v991_v33 = vpop.eup %990 }
 0x215   :  { %v993_v34 = vpop.eup %992  ;;  %s1075_s17 = smov [#allocation5]  }
 0x216   :  { %s678_s6 = sshll.u32 %s1075_s17, 4  ;;  %v995_v35 = vpop.eup %994  ;;  %s679_s6 = int_to_ptr.vmem [resolvable:$true] %s678_s6 }
 0x217   :  { %v997_v36 = vpop.eup %996  ;;  %v670_v37 = vmul.f32 %v995_v35, %v991_v33  ;;  %s1042_s18 = scalar_lea.vmem %s679_s6, 256  ;;  %p1047_p3 = scmp.lt.s32.totalorder %s679_s6, %s679_s6 }
 0x218   :  { %v469_v38 = vmul.f32 %v997_v36, %v993_v34  ;;  %p1043_p2 = scmp.ne.s32.totalorder %s679_s6, %s1042_s18  ;;  %p1048_p4 = scmp.lt.s32.totalorder %s1042_s18, %s1042_s18 }
 0x219   :  { %671 = vst [vmem:[#allocation5 + $0x8] sm:$0xff] %v670_v37 }
 0x21a   :  { %470 = vst [vmem:[#allocation5] sm:$0xff] %v469_v38  ;;  %p1049_p5 = por %p1048_p4, %p1047_p3 }
 0x21c   :  { %p1050_p6 = pnand %p1049_p5, %p1043_p2 }
 0x21e   :  { %1053 = shalt.err (!%p1050_p6)
}
 0x21f   :  { %s1054_s20 = scalar_lea.hbm %s1243_s7, 256 }
 0x220   :  { %p1055_p7 = scmp.ne.s32.totalorder %s1243_s7, %s1054_s20  ;;  %p1058_p8 = scmp.lt.u32.totalorder %s1054_s20, %s1243_s7 }
 0x222   :  { %p1060_p9 = pnand %p1058_p8, %p1055_p7 }
 0x224   :  { %1063 = shalt.err (!%p1060_p9)
}
 0x225   :  { %684 = dma.vmem_to_hbm [thread:$0]  %s679_s6, 256, %s1243_s7, [#allocation4], %s1071_s15, %s1071_s15, %s1072_s16  }
 0x226   :  { %1066 = dma.done.wait [#allocation4], 256  }
 0x227   :  { %1067 = vsyncadd [#allocation4], 4294967040 }
 0x228   :  { %1068 = dma.done.wait [#allocation7], 256  }
 0x229   :  { %1069 = vsyncadd [#allocation7], 4294967040 }
 0x22a   :  { %703 = vsyncpa [#allocation3], 1 }
 0x22b   :  { %704 = vsyncpa [#allocation4], 1 }
 0x22c   :  { %705 = vsyncpa [#allocation7], 1 }

</bundles_post_ra>
